<compile_context>
chip_gen: v6e
topology: v6e:2x2x1
jax: 0.10.0
libtpu: 0.0.40
codegen_flags: <defaults>
</compile_context>

<pallas_src>
import jax
import jax.numpy as jnp
from jax.experimental import pallas as pl
from jax.experimental.pallas import tpu as pltpu


def _round_up(x, m):
    return ((x + m - 1) // m) * m


# ----------------------------------------------------------------------------
# Kernel: 4 chained matmuls, single unmasked full-tile writeback.
# ----------------------------------------------------------------------------
def combine_kernel(obs_ref,
                   w_in_ref, b_in_ref,
                   w_c1_ref, b_c1_ref,
                   w_c2_ref, b_c2_ref,
                   w_hd_ref, b_hd_ref,
                   out_ref):
    w_in = w_in_ref[...]
    cdt = w_in.dtype                       # MXU feed dtype (f32 or bf16)
    x = obs_ref[...].astype(cdt)

    # input_net: Linear + ReLU
    h = jnp.maximum(
        jnp.dot(x, w_in, preferred_element_type=jnp.float32)
        + b_in_ref[...], 0.0)

    # q_net shared trunk: two Linear + ReLU layers
    f = jnp.maximum(
        jnp.dot(h.astype(cdt), w_c1_ref[...],
                preferred_element_type=jnp.float32) + b_c1_ref[...], 0.0)
    f = jnp.maximum(
        jnp.dot(f.astype(cdt), w_c2_ref[...],
                preferred_element_type=jnp.float32) + b_c2_ref[...], 0.0)

    # Fused heads: cols = [V | A (output_net folded) | Q (dueling folded) | 0..]
    # Padded weight/bias columns are exactly zero, so padded output lanes are
    # exactly zero -> one unmasked full-tile store.
    heads = jnp.dot(f.astype(cdt), w_hd_ref[...],
                    preferred_element_type=jnp.float32) + b_hd_ref[...]
    out_ref[...] = heads


# ----------------------------------------------------------------------------
# Param prep: pad, fold output_net into A, fold dueling combine into Q cols.
# ----------------------------------------------------------------------------
def prepare_params(p, weight_dtype=jnp.float32):
    obs_dim, hidden = p["w_in"].shape
    feat = p["w_c2"].shape[1]
    act_tgt = p["w_o"].shape[1]

    obs_p = _round_up(obs_dim, 8)            # sublane-only pad; NOT 128 lanes
    hid_p = _round_up(hidden, 128)
    feat_p = _round_up(feat, 128)
    head_p = _round_up(1 + 2 * act_tgt, 128)

    def pad2(w, r, c):
        return jnp.pad(w, ((0, r - w.shape[0]), (0, c - w.shape[1])))

    # Fold output_net into the advantage head (two chained Linears == one).
    w_ao = p["w_a"] @ p["w_o"]                           # (feat, act_tgt)
    b_ao = p["b_a"] @ p["w_o"] + p["b_o"]                # (1, act_tgt)

    # Fold the dueling combine Q = V + (A - mean(A)) into head columns.
    w_q = p["w_v"] + w_ao - jnp.mean(w_ao, axis=1, keepdims=True)
    b_q = p["b_v"] + b_ao - jnp.mean(b_ao, axis=1, keepdims=True)

    # One head matmul: [V | A | Q]
    w_heads = jnp.concatenate([p["w_v"], w_ao, w_q], axis=1)  # (feat, 1+2n)
    b_heads = jnp.concatenate([p["b_v"], b_ao, b_q], axis=1)  # (1, 1+2n)

    prepared = {
        "w_in": pad2(p["w_in"], obs_p, hid_p).astype(weight_dtype),
        "b_in": pad2(p["b_in"], 1, hid_p).astype(jnp.float32),
        "w_c1": pad2(p["w_c1"], hid_p, feat_p).astype(weight_dtype),
        "b_c1": pad2(p["b_c1"], 1, feat_p).astype(jnp.float32),
        "w_c2": pad2(p["w_c2"], feat_p, feat_p).astype(weight_dtype),
        "b_c2": pad2(p["b_c2"], 1, feat_p).astype(jnp.float32),
        "w_hd": pad2(w_heads, feat_p, head_p).astype(weight_dtype),
        "b_hd": pad2(b_heads, 1, head_p).astype(jnp.float32),
    }
    meta = {"obs_dim": obs_dim, "obs_p": obs_p, "n_tgt": act_tgt}
    return prepared, meta


# ----------------------------------------------------------------------------
# Wrapper
# ----------------------------------------------------------------------------
def combine_forward(obs, prepared, meta, tile_b=512, min_grid_tiles=1):
    # tile_b: per-step VMEM is tiny, so 512-2048 is fine on all generations.
    # min_grid_tiles: pass 2 on v7x (2 TensorCores/chip) so both cores get work.
    B, obs_dim = obs.shape
    n_tgt = meta["n_tgt"]
    obs_p = meta["obs_p"]
    head_p = prepared["w_hd"].shape[1]
    act_dtype = prepared["w_in"].dtype       # feed the MXU in the weight dtype

    b8 = _round_up(B, 8)
    tile_b = min(int(tile_b), b8)
    if min_grid_tiles > 1:
        tile_b = min(tile_b, -(-b8 // min_grid_tiles))
    tile_b = max(8, _round_up(tile_b, 8))    # always a multiple of 8
    b_pad = _round_up(B, tile_b)
    num_tiles = b_pad // tile_b

    # Pad batch axis only; feature axis padded (at most) to a multiple of 8.
    obs_padded = jnp.pad(obs, ((0, b_pad - B), (0, obs_p - obs_dim)))
    obs_padded = obs_padded.astype(act_dtype)

    weight_keys = ("w_in", "b_in", "w_c1", "b_c1", "w_c2", "b_c2",
                   "w_hd", "b_hd")
    weights = [prepared[k] for k in weight_keys]

    def const_spec(arr):
        # Full-array block + constant index -> VMEM-resident, no re-DMA.
        return pl.BlockSpec(arr.shape, lambda i: (0, 0))

    slab = pl.pallas_call(
        combine_kernel,
        out_shape=jax.ShapeDtypeStruct((b_pad, head_p), jnp.float32),
        grid=(num_tiles,),
        in_specs=[pl.BlockSpec((tile_b, obs_p), lambda i: (i, 0))]
                 + [const_spec(w) for w in weights],
        out_specs=pl.BlockSpec((tile_b, head_p), lambda i: (i, 0)),
        compiler_params=pltpu.CompilerParams(
            dimension_semantics=("parallel",)),
        # At production widths (e.g. feat=2048) pass
        # vmem_limit_bytes via CompilerParams; unnecessary at these sizes.
    )(obs_padded, *weights)

    # Module contract returns (V, A, Q); if a consumer only needs Q, slice just
    # the Q columns to avoid re-reading the whole slab.
    v = slab[:B, 0:1]
    a = slab[:B, 1:1 + n_tgt]
    q = slab[:B, 1 + n_tgt:1 + 2 * n_tgt]
    return v, a, q


# ----------------------------------------------------------------------------
# Test utilities
# ----------------------------------------------------------------------------
def init_params(key, obs_dim, hidden, feat, act_src, act_tgt):
    ks = jax.random.split(key, 7)

    def lin(k, fan_in, fan_out):
        w = (jax.random.normal(k, (fan_in, fan_out), jnp.float32)
             * (1.0 / jnp.sqrt(fan_in)))
        b = jnp.zeros((1, fan_out), jnp.float32) + 0.01
        return w, b

    p = {}
    p["w_in"], p["b_in"] = lin(ks[0], obs_dim, hidden)
    p["w_c1"], p["b_c1"] = lin(ks[1], hidden, feat)
    p["w_c2"], p["b_c2"] = lin(ks[2], feat, feat)
    p["w_v"], p["b_v"] = lin(ks[3], feat, 1)
    p["w_a"], p["b_a"] = lin(ks[4], feat, act_src)
    p["w_o"], p["b_o"] = lin(ks[5], act_src, act_tgt)
    return p


def reference_forward(obs, p):
    h = jnp.maximum(obs @ p["w_in"] + p["b_in"], 0.0)
    f = jnp.maximum(h @ p["w_c1"] + p["b_c1"], 0.0)
    f = jnp.maximum(f @ p["w_c2"] + p["b_c2"], 0.0)
    v = f @ p["w_v"] + p["b_v"]
    a = (f @ p["w_a"] + p["b_a"]) @ p["w_o"] + p["b_o"]
    q = v + (a - jnp.mean(a, axis=1, keepdims=True))
    return v, a, q


if __name__ == "__main__":
    B, OBS, HID, FEAT, ACT_SRC, ACT_TGT = 16, 16, 32, 64, 8, 5

    key = jax.random.PRNGKey(0)
    k_obs, k_par = jax.random.split(key)
    obs = jax.random.normal(k_obs, (B, OBS), jnp.float32)
    params = init_params(k_par, OBS, HID, FEAT, ACT_SRC, ACT_TGT)

    # fp32 weights for the exact small-shape test; pass weight_dtype=jnp.bfloat16
    # on v6e/v7x to halve weight/activation DMA bytes (fp32 accumulation kept,
    # expect ~1e-2 level tolerances in that mode).
    prepared, meta = prepare_params(params, weight_dtype=jnp.float32)

    # tile_b=8 just to exercise a multi-step grid at this tiny batch; use the
    # default 512 (and min_grid_tiles=2 on v7x) in production.
    V, A, Q = combine_forward(obs, prepared, meta, tile_b=8)
    jax.block_until_ready((V, A, Q))

    V_ref, A_ref, Q_ref = reference_forward(obs, params)
    assert V.shape == V_ref.shape and A.shape == A_ref.shape and Q.shape == Q_ref.shape
    assert jnp.allclose(V, V_ref, atol=1e-4, rtol=1e-4), "V mismatch"
    assert jnp.allclose(A, A_ref, atol=1e-4, rtol=1e-4), "A mismatch"
    assert jnp.allclose(Q, Q_ref, atol=1e-4, rtol=1e-4), "Q mismatch"

    print("KERNEL_OK")
</pallas_src>

<mosaic_0001>
module attributes {stable_mosaic.version = 11 : i64} {
  func.func @combine_kernel(%arg0: i32, %arg1: memref<8x16xf32, #tpu.memory_space<vmem>>, %arg2: memref<16x128xf32, #tpu.memory_space<vmem>>, %arg3: memref<1x128xf32, #tpu.memory_space<vmem>>, %arg4: memref<128x128xf32, #tpu.memory_space<vmem>>, %arg5: memref<1x128xf32, #tpu.memory_space<vmem>>, %arg6: memref<128x128xf32, #tpu.memory_space<vmem>>, %arg7: memref<1x128xf32, #tpu.memory_space<vmem>>, %arg8: memref<128x128xf32, #tpu.memory_space<vmem>>, %arg9: memref<1x128xf32, #tpu.memory_space<vmem>>, %arg10: memref<8x128xf32, #tpu.memory_space<vmem>>) attributes {dimension_semantics = [#tpu.dimension_semantics<parallel>], iteration_bounds = array<i64: 2>, scalar_prefetch = 0 : i64, scratch_operands = 0 : i64, tpu.core_type = #tpu.core_type<tc>, window_params = [{transform_indices = @transform_0, window_bounds = array<i64: 8, 16>}, {pipeline_mode = #tpu.pipeline_mode<synchronous>, transform_indices = @transform_1, window_bounds = array<i64: 16, 128>}, {pipeline_mode = #tpu.pipeline_mode<synchronous>, transform_indices = @transform_2, window_bounds = array<i64: 1, 128>}, {pipeline_mode = #tpu.pipeline_mode<synchronous>, transform_indices = @transform_3, window_bounds = array<i64: 128, 128>}, {pipeline_mode = #tpu.pipeline_mode<synchronous>, transform_indices = @transform_4, window_bounds = array<i64: 1, 128>}, {pipeline_mode = #tpu.pipeline_mode<synchronous>, transform_indices = @transform_5, window_bounds = array<i64: 128, 128>}, {pipeline_mode = #tpu.pipeline_mode<synchronous>, transform_indices = @transform_6, window_bounds = array<i64: 1, 128>}, {pipeline_mode = #tpu.pipeline_mode<synchronous>, transform_indices = @transform_7, window_bounds = array<i64: 128, 128>}, {pipeline_mode = #tpu.pipeline_mode<synchronous>, transform_indices = @transform_8, window_bounds = array<i64: 1, 128>}, {transform_indices = @transform_9, window_bounds = array<i64: 8, 128>}]} {
    %c0 = arith.constant 0 : index
    %c0_0 = arith.constant 0 : index
    %0 = vector.load %arg2[%c0, %c0_0] : memref<16x128xf32, #tpu.memory_space<vmem>>, vector<16x128xf32>
    %c0_1 = arith.constant 0 : index
    %c0_2 = arith.constant 0 : index
    %1 = vector.load %arg1[%c0_1, %c0_2] : memref<8x16xf32, #tpu.memory_space<vmem>>, vector<8x16xf32>
    %cst = arith.constant dense<0.000000e+00> : vector<8x128xf32>
    %2 = tpu.matmul %1, %0, %cst {dimension_numbers = #tpu.dot_dimension_numbers<[1], [0], [0], [1], [0, 0, 1, 1], [], []>} : vector<8x16xf32>, vector<16x128xf32>, vector<8x128xf32> -> vector<8x128xf32>
    %c0_3 = arith.constant 0 : index
    %c0_4 = arith.constant 0 : index
    %3 = vector.load %arg3[%c0_3, %c0_4] : memref<1x128xf32, #tpu.memory_space<vmem>>, vector<1x128xf32>
    %4 = vector.broadcast %3 : vector<1x128xf32> to vector<8x128xf32>
    %5 = arith.addf %2, %4 : vector<8x128xf32>
    %cst_5 = arith.constant 0.000000e+00 : f32
    %6 = vector.broadcast %cst_5 : f32 to vector<8x128xf32>
    %7 = arith.maximumf %5, %6 : vector<8x128xf32>
    %c0_6 = arith.constant 0 : index
    %c0_7 = arith.constant 0 : index
    %8 = vector.load %arg4[%c0_6, %c0_7] : memref<128x128xf32, #tpu.memory_space<vmem>>, vector<128x128xf32>
    %cst_8 = arith.constant dense<0.000000e+00> : vector<8x128xf32>
    %9 = tpu.matmul %7, %8, %cst_8 {dimension_numbers = #tpu.dot_dimension_numbers<[1], [0], [0], [1], [0, 0, 1, 1], [], []>} : vector<8x128xf32>, vector<128x128xf32>, vector<8x128xf32> -> vector<8x128xf32>
    %c0_9 = arith.constant 0 : index
    %c0_10 = arith.constant 0 : index
    %10 = vector.load %arg5[%c0_9, %c0_10] : memref<1x128xf32, #tpu.memory_space<vmem>>, vector<1x128xf32>
    %11 = vector.broadcast %10 : vector<1x128xf32> to vector<8x128xf32>
    %12 = arith.addf %9, %11 : vector<8x128xf32>
    %cst_11 = arith.constant 0.000000e+00 : f32
    %13 = vector.broadcast %cst_11 : f32 to vector<8x128xf32>
    %14 = arith.maximumf %12, %13 : vector<8x128xf32>
    %c0_12 = arith.constant 0 : index
    %c0_13 = arith.constant 0 : index
    %15 = vector.load %arg6[%c0_12, %c0_13] : memref<128x128xf32, #tpu.memory_space<vmem>>, vector<128x128xf32>
    %cst_14 = arith.constant dense<0.000000e+00> : vector<8x128xf32>
    %16 = tpu.matmul %14, %15, %cst_14 {dimension_numbers = #tpu.dot_dimension_numbers<[1], [0], [0], [1], [0, 0, 1, 1], [], []>} : vector<8x128xf32>, vector<128x128xf32>, vector<8x128xf32> -> vector<8x128xf32>
    %c0_15 = arith.constant 0 : index
    %c0_16 = arith.constant 0 : index
    %17 = vector.load %arg7[%c0_15, %c0_16] : memref<1x128xf32, #tpu.memory_space<vmem>>, vector<1x128xf32>
    %18 = vector.broadcast %17 : vector<1x128xf32> to vector<8x128xf32>
    %19 = arith.addf %16, %18 : vector<8x128xf32>
    %cst_17 = arith.constant 0.000000e+00 : f32
    %20 = vector.broadcast %cst_17 : f32 to vector<8x128xf32>
    %21 = arith.maximumf %19, %20 : vector<8x128xf32>
    %c0_18 = arith.constant 0 : index
    %c0_19 = arith.constant 0 : index
    %22 = vector.load %arg8[%c0_18, %c0_19] : memref<128x128xf32, #tpu.memory_space<vmem>>, vector<128x128xf32>
    %cst_20 = arith.constant dense<0.000000e+00> : vector<8x128xf32>
    %23 = tpu.matmul %21, %22, %cst_20 {dimension_numbers = #tpu.dot_dimension_numbers<[1], [0], [0], [1], [0, 0, 1, 1], [], []>} : vector<8x128xf32>, vector<128x128xf32>, vector<8x128xf32> -> vector<8x128xf32>
    %c0_21 = arith.constant 0 : index
    %c0_22 = arith.constant 0 : index
    %24 = vector.load %arg9[%c0_21, %c0_22] : memref<1x128xf32, #tpu.memory_space<vmem>>, vector<1x128xf32>
    %25 = vector.broadcast %24 : vector<1x128xf32> to vector<8x128xf32>
    %26 = arith.addf %23, %25 : vector<8x128xf32>
    %c0_23 = arith.constant 0 : index
    %c0_24 = arith.constant 0 : index
    %27 = vector.load %arg10[%c0_23, %c0_24] : memref<8x128xf32, #tpu.memory_space<vmem>>, vector<8x128xf32>
    tpu.vector_store %arg10[%c0_23, %c0_24], %26 {strides = array<i32>} : memref<8x128xf32, #tpu.memory_space<vmem>>, vector<8x128xf32>,
    return
  }
  func.func @transform_0(%arg0: i32) -> (i32, i32) {
    %c0_i32 = arith.constant 0 : i32
    %c0_i32_0 = arith.constant 0 : i32
    return %arg0, %c0_i32 : i32, i32
  }
  func.func @transform_1(%arg0: i32) -> (i32, i32) {
    %c0_i32 = arith.constant 0 : i32
    %c0_i32_0 = arith.constant 0 : i32
    %c0_i32_1 = arith.constant 0 : i32
    return %c0_i32, %c0_i32_0 : i32, i32
  }
  func.func @transform_2(%arg0: i32) -> (i32, i32) {
    %c0_i32 = arith.constant 0 : i32
    %c0_i32_0 = arith.constant 0 : i32
    %c0_i32_1 = arith.constant 0 : i32
    return %c0_i32, %c0_i32_0 : i32, i32
  }
  func.func @transform_3(%arg0: i32) -> (i32, i32) {
    %c0_i32 = arith.constant 0 : i32
    %c0_i32_0 = arith.constant 0 : i32
    %c0_i32_1 = arith.constant 0 : i32
    return %c0_i32, %c0_i32_0 : i32, i32
  }
  func.func @transform_4(%arg0: i32) -> (i32, i32) {
    %c0_i32 = arith.constant 0 : i32
    %c0_i32_0 = arith.constant 0 : i32
    %c0_i32_1 = arith.constant 0 : i32
    return %c0_i32, %c0_i32_0 : i32, i32
  }
  func.func @transform_5(%arg0: i32) -> (i32, i32) {
    %c0_i32 = arith.constant 0 : i32
    %c0_i32_0 = arith.constant 0 : i32
    %c0_i32_1 = arith.constant 0 : i32
    return %c0_i32, %c0_i32_0 : i32, i32
  }
  func.func @transform_6(%arg0: i32) -> (i32, i32) {
    %c0_i32 = arith.constant 0 : i32
    %c0_i32_0 = arith.constant 0 : i32
    %c0_i32_1 = arith.constant 0 : i32
    return %c0_i32, %c0_i32_0 : i32, i32
  }
  func.func @transform_7(%arg0: i32) -> (i32, i32) {
    %c0_i32 = arith.constant 0 : i32
    %c0_i32_0 = arith.constant 0 : i32
    %c0_i32_1 = arith.constant 0 : i32
    return %c0_i32, %c0_i32_0 : i32, i32
  }
  func.func @transform_8(%arg0: i32) -> (i32, i32) {
    %c0_i32 = arith.constant 0 : i32
    %c0_i32_0 = arith.constant 0 : i32
    %c0_i32_1 = arith.constant 0 : i32
    return %c0_i32, %c0_i32_0 : i32, i32
  }
  func.func @transform_9(%arg0: i32) -> (i32, i32) {
    %c0_i32 = arith.constant 0 : i32
    %c0_i32_0 = arith.constant 0 : i32
    return %arg0, %c0_i32 : i32, i32
  }
}

</mosaic_0001>

<bundles_post_ra>
// kernel: tpu_custom_call.1
= control target key start
LH: loop header
LB: loop body
LE: loop exit
PB: predicated region body
PF: predicated region fallthrough
CT: control target
= control target key end

     0   :  { %s1738_s0 = inlined_call_operand.hbm [shape: f32[16,16], index: 0, kind: input, shape index: {}]   ;;  %s1739_s1 = inlined_call_operand.hbm [shape: f32[16,128], index: 1, kind: input, shape index: {}]   ;;  %s1740_s2 = inlined_call_operand.vmem [shape: f32[1,128], index: 2, kind: input, shape index: {}]   ;;  %s1741_s3 = inlined_call_operand.hbm [shape: f32[128,128], index: 3, kind: input, shape index: {}]   ;;  %s1742_s4 = inlined_call_operand.vmem [shape: f32[1,128], index: 4, kind: input, shape index: {}]   ;;  %s1743_s5 = inlined_call_operand.hbm [shape: f32[128,128], index: 5, kind: input, shape index: {}]   ;;  %s1744_s6 = inlined_call_operand.vmem [shape: f32[1,128], index: 6, kind: input, shape index: {}]   ;;  %s1745_s7 = inlined_call_operand.hbm [shape: f32[128,128], index: 7, kind: input, shape index: {}]   ;;  %s1746_s8 = inlined_call_operand.vmem [shape: f32[1,128], index: 8, kind: input, shape index: {}]   ;;  %s1747_s9 = inlined_call_operand.hbm [shape: f32[16,128], index: 9, kind: output, shape index: {}]  }
   0x1   :  { %1752 = sst [smem:[#allocation16_spill]] %s1739_s1 }
   0x2   :  { %1753 = sst [smem:[#allocation17_spill]] %s1741_s3 }
   0x3   :  { %1754 = sst [smem:[#allocation18_spill]] %s1743_s5 }
   0x4   :  { %1755 = sst [smem:[#allocation19_spill]] %s1745_s7 }
   0x5   :  { %14 = vsyncpa [#allocation3], 0 }
   0x6   :  { %16 = vsyncpa [#allocation3 + $0x1], 0 }
   0x7   :  { %17 = vsyncpa [#allocation6], 0 }
   0x8   :  { %18 = vsyncpa [#allocation9], 0 }
   0x9   :  { %19 = vsyncpa [#allocation4], 0 }
   0xa   :  { %21 = vsyncpa [#allocation4 + $0x1], 0  ;;  %s1443_s30 = smov 0   ;;  %s1445_s10 = smov 0  }
   0xb   :  { %s1447_s11 = smov 0   ;;  %s1449_s12 = smov 0  }
   0xc LB: > { %s1383_s13 = smov [#allocation5]   ;;  %s1464_s15 = sadd.s32 4294967295, %s1381_s12   ;;  %s1381_s12 = sphi %s1449_s12, %s1779_s12   ;;  %s1377_s11 = sphi %s1447_s11, %s1778_s11   ;;  %s1373_s10 = sphi %s1445_s10, %s1777_s10   ;;  %s1369_s30 = sphi %s1443_s30, %s1776_s30  }
   0xd   : > { %s264_s14 = sshll.u32 %s1383_s13, 4  ;;  %p896_p0 = scmp.ge.s32.totalorder %s1381_s12, 1  ;;  %s265_s14 = int_to_ptr.vmem [resolvable:$true] %s264_s14 }
   0xe   : > { %p1748_p1 = scmp.eq.s32.totalorder %s1464_s15, 0  ;;  %p252_p2 = scmp.lt.s32.totalorder %s1381_s12, 3 }
   0xf   : > { %s1384_s17 = smov [#allocation8]   ;;  %s1385_s20 = smov [#allocation7]  }
  0x10   : > { %p1469_p3 = pnand %p896_p0, %p252_p2  ;;  %s296_s18 = sshll.u32 %s1384_s17, 4  ;;  %s1482_s18 = int_to_ptr.vmem [resolvable:$true] %s296_s18 }
  0x11   : > { %s280_s21 = sshll.u32 %s1385_s20, 4  ;;  %s1188_s22 = scalar_lea.vmem %s265_s14, 256  ;;  %s1484_s21 = int_to_ptr.vmem [resolvable:$true] %s280_s21 }
  0x12   : > { %s1756_s16 = scalar_select %p1469_p3, 1, 0 }
  0x13   : > { %p1106_p5 = pneg %p1469_p3  ;;  %p1189_p8 = scmp.ne.s32.totalorder %s265_s14, %s1188_s22 }
  0x14   : > { %p1196_p11 = scmp.lt.s32.totalorder %s265_s14, %s265_s14  ;;  %p1197_p12 = scmp.lt.s32.totalorder %s1188_s22, %s1188_s22 }
  0x15   : > { %p1478_p6 = pnand %p1106_p5, %p1748_p1 }
  0x16   : > { %p1198_p13 = por %p1197_p12, %p1196_p11 }
  0x17   : > { %p1179_p7 = pneg %p1478_p6 }
  0x19   : > { %p1191_p9 = pnand %p1189_p8, %p1179_p7 }
  0x1b   : > { %p1192_p10 = pneg %p1191_p9 }
  0x1d   : > { %p1199_p0 = pnand %p1198_p13, %p1192_p10 }
  0x1f   : > { %1202 = shalt.err (!%p1199_p0)
}
  0x20   : > { %s1386_s23 = smov 128   ;;  %s1387_s24 = smov 8  }
  0x21   : > { %s1758_s1 = sld [smem:[#allocation16_spill]]  ;;  %s1214_s27 = scalar_lea.vmem %s1482_s18, 2048 }
  0x22   : > { %p1215_p2 = scmp.ne.s32.totalorder %s1482_s18, %s1214_s27  ;;  %p1222_p9 = scmp.lt.s32.totalorder %s1482_s18, %s1482_s18 }
  0x23   : > { %p1223_p10 = scmp.lt.s32.totalorder %s1214_s27, %s1214_s27 }
  0x24   : > { %p1217_p5 = pnand %p1215_p2, %p1179_p7 }
  0x25   : > { %p1224_p11 = por %p1223_p10, %p1222_p9 }
  0x26   : > { %p1218_p8 = pneg %p1217_p5 }
  0x27   : > { %1109 = dma.hbm_to_vmem [thread:$0]  (!%p1478_p6), %s1758_s1, 256, %s265_s14, [#allocation6], %s1386_s23, %s1386_s23, %s1387_s24  }
  0x28   : > { %p1225_p12 = pnand %p1224_p11, %p1218_p8 }
  0x2a   : > { %1228 = shalt.err (!%p1225_p12)
}
  0x2b   : > { %s1759_s5 = sld [smem:[#allocation18_spill]]  ;;  %s1240_s13 = scalar_lea.vmem %s1484_s21, 2048 }
  0x2c   : > { %p1241_p13 = scmp.ne.s32.totalorder %s1484_s21, %s1240_s13  ;;  %p1248_p5 = scmp.lt.s32.totalorder %s1484_s21, %s1484_s21 }
  0x2d   : > { %p1249_p8 = scmp.lt.s32.totalorder %s1240_s13, %s1240_s13 }
  0x2e   : > { %p1243_p0 = pnand %p1241_p13, %p1179_p7 }
  0x2f   : > { %p1250_p9 = por %p1249_p8, %p1248_p5 }
  0x30   : > { %p1244_p2 = pneg %p1243_p0 }
  0x31   : > { %1115 = dma.hbm_to_vmem [thread:$0]  (!%p1478_p6), %s1759_s5, 2048, %s1482_s18, [#allocation9], %s1386_s23, %s1386_s23, %s1387_s24  }
  0x32   : > { %p1251_p10 = pnand %p1250_p9, %p1244_p2 }
  0x34   : > { %1254 = shalt.err (!%p1251_p10)
}
  0x35   : > { %s1760_s3 = sld [smem:[#allocation17_spill]]  ;;  %s1388_s18 = smov [#allocation10]  }
  0x36   : > { %s312_s20 = sshll.u32 %s1388_s18, 4  ;;  %s313_s20 = int_to_ptr.vmem [resolvable:$true] %s312_s20 }
  0x37   : > { %s1266_s22 = scalar_lea.vmem %s313_s20, 2048  ;;  %p1274_p0 = scmp.lt.s32.totalorder %s313_s20, %s313_s20 }
  0x38   : > { %p1267_p11 = scmp.ne.s32.totalorder %s313_s20, %s1266_s22  ;;  %p1275_p2 = scmp.lt.s32.totalorder %s1266_s22, %s1266_s22 }
  0x3a   : > { %p1269_p12 = pnand %p1267_p11, %p1179_p7  ;;  %p1276_p5 = por %p1275_p2, %p1274_p0 }
  0x3b   : > { %1112 = dma.hbm_to_vmem [thread:$0]  (!%p1478_p6), %s1760_s3, 2048, %s1484_s21, [#allocation6], %s1386_s23, %s1386_s23, %s1387_s24  }
  0x3c   : > { %p1270_p13 = pneg %p1269_p12 }
  0x3e   : > { %p1277_p8 = pnand %p1276_p5, %p1270_p13 }
  0x40   : > { %1280 = shalt.err (!%p1277_p8)
}
  0x41   : > { %s1761_s7 = sld [smem:[#allocation19_spill]]  ;;  %s895_s19 = sadd.s32 4294967294, %s1381_s12  }
  0x42   : > { %s1544_s26 = sadd.s32 1, %s1381_s12   ;;  %s34_s28 = sadd.s32 1, %s1377_s11 }
  0x43   : > { %s31_s27 = ssub.s32 %s1381_s12, %s1544_s26  ;;  %p41_p9 = scmp.ne.s32.totalorder %s1377_s11, %s1373_s10 }
  0x44   : > { %p32_p7 = scmp.eq.s32.totalorder %s31_s27, 0  ;;  %p42_p10 = scmp.eq.s32.totalorder %s1381_s12, 0 }
  0x45   : > { %p47_p11 = scmp.ne.s32.totalorder %s1373_s10, %s1369_s30  ;;  %p239_p13 = scmp.eq.s32.totalorder %s1464_s15, 1 }
  0x46   : > { %s1555_s29 = scalar_select %p32_p7, %s1377_s11, %s34_s28  }
  0x47   : > { %1118 = dma.hbm_to_vmem [thread:$0]  (!%p1478_p6), %s1761_s7, 2048, %s313_s20, [#allocation9], %s1386_s23, %s1386_s23, %s1387_s24  }
  0x48   : > { %p1557_p12 = por %p42_p10, %p41_p9  ;;  %p1563_p6 = por %p1748_p1, %p47_p11 }
  0x49   : > { %p245_p0 = scmp.eq.s32.totalorder %s895_s19, 1  ;;  %p1131_p2 = scmp.lt.s32.totalorder %s1381_s12, 2 }
  0x4a   : > { %s1763_s23 = scalar_select %p1563_p6, 1, 0 }
  0x4b   : > { %s329_s24 = sand.u32 1, %s1377_s11   ;;  %p1570_p5 = por %p239_p13, %p41_p9 }
  0x4c   : > { %p1574_p8 = por %p245_p0, %p47_p11  ;;  %s902_s18 = sshll.u32 %s329_s24, 3 }
  0x4d   : > { %s1764_s14 = scalar_select %p1570_p5, 1, 0 }
  0x4e   : > { %s1765_s17 = scalar_select %p1574_p8, 1, 0 }
  0x4f   : > { %s903_s20 = sshll.u32 %s1381_s12, 7  ;;  %s333_s19 = scalar_lea.vmem [#allocation2], %s902_s18 }
  0x50   : > { %s1582_s25 = scalar_lea.hbm %s1738_s0, %s903_s20  ;;  %s340_s27 = sshll.u32 %s333_s19, 4  ;;  %s341_s27 = int_to_ptr.vmem [resolvable:$true] %s340_s27 }
  0x51   : > { %p1586_p7 = pnand %p1131_p2, %p1557_p12  ;;  %s330_s1 = scalar_lea.sflag [#allocation3], %s329_s24 }
  0x52   : > { %s1281_s3 = scalar_lea.hbm %s1582_s25, 128  ;;  %s1286_s21 = scalar_lea.hbm %s1738_s0, 256 }
  0x53   : > { %p1282_p9 = scmp.ne.s32.totalorder %s1582_s25, %s1281_s3  ;;  %p1283_p10 = pneg %p1586_p7 }
  0x54   : > { %p1287_p0 = scmp.lt.s32.totalorder %s1582_s25, %s1738_s0  ;;  %p1288_p12 = scmp.lt.s32.totalorder %s1286_s21, %s1281_s3 }
  0x55   : > { %p1284_p11 = pnand %p1283_p10, %p1282_p9 }
  0x56   : > { %p1289_p2 = por %p1288_p12, %p1287_p0 }
  0x57   : > { %p1285_p13 = pneg %p1284_p11 }
  0x59   : > { %p1290_p4 = pnand %p1289_p2, %p1285_p13 }
  0x5b   : > { %1293 = shalt.err (!%p1290_p4)
}
  0x5c   : > { %s1294_s13 = scalar_lea.vmem %s341_s27, 128  ;;  %s1389_s24 = smov [#allocation2]  }
  0x5d   : > { %p1295_p1 = scmp.ne.s32.totalorder %s341_s27, %s1294_s13  ;;  %s1299_s5 = sshll.u32 %s1389_s24, 4  ;;  %s1300_s5 = int_to_ptr.vmem [resolvable:$false] %s1299_s5 }
  0x5e   : > { %s1301_s7 = scalar_lea.vmem %s1300_s5, 256  ;;  %p1302_p9 = scmp.lt.s32.totalorder %s341_s27, %s1300_s5 }
  0x5f   : > { %p1297_p8 = pnand %p1295_p1, %p1283_p10  ;;  %p1303_p11 = scmp.lt.s32.totalorder %s1301_s7, %s1294_s13 }
  0x61   : > { %p1298_p5 = pneg %p1297_p8  ;;  %p1304_p6 = por %p1303_p11, %p1302_p9 }
  0x63   : > { %p1305_p3 = pnand %p1304_p6, %p1298_p5 }
  0x65   : > { %1308 = shalt.err (!%p1305_p3)
}
  0x66   : > { %1122 = dma.hbm_to_vmem [thread:$0]  (!%p1586_p7), %s1582_s25, 128, %s341_s27, %s330_s1  }
  0x67   : > { %p1767_p13 = scmp.ne.s32.totalorder %s1756_s16, 0 }
  0x68   : > { %s1607_s3 = sand.u32 (!%p1767_p13), 1, %s1373_s10   ;;  %p1768_p1 = scmp.ne.s32.totalorder (!%p1767_p13), %s1763_s23, 0 }
  0x69   : > { %349 = sbr.rel (%p1767_p13) target bundleno = 922 (0x39a), region = 56  ;;  %s905_s20 = sshll.u32 (!%p1767_p13), %s1607_s3, 3 }
  0x6a   : > { %s352_s5 = scalar_lea.sflag (!%p1767_p13), [#allocation3], %s1607_s3  ;;  %s355_s7 = scalar_lea.vmem (!%p1767_p13), [#allocation2], %s905_s20 }
  0x6e   : > { %1352 = dma.done.wait (%p1768_p1), %s352_s5, 128  }
  0x6f   : > { %1354 = vsyncadd (%p1768_p1), %s352_s5, 4294967168  ;;  %p1769_p3 = scmp.eq.s32.totalorder %s1464_s15, 0 }
  0x71   : > { %1356 = dma.done.wait (%p1769_p3), [#allocation6], 2304   ;;  %p1770_p4 = pmov %p1769_p3 }
  0x72   : > { %p1771_p6 = pmov %p1769_p3 }
  0x73   : > { %1358 = vsyncadd (%p1770_p4), [#allocation6], 4294964992 }
  0x74   : > { %1360 = dma.done.wait (%p1771_p6), [#allocation9], 4096   ;;  %p1772_p5 = pmov %p1769_p3 }
  0x75   : > { %v1390_v0 = vmov 0.0   ;;  %vm1391_vm0 = vmmov 0   ;;  %v407_v1 = vld [vmem:[#allocation5 + $0x8] sm:$0xff]  ;;  %v406_v2 = vld [vmem:[#allocation5] sm:$0xff]  ;;  %v408_v3 = vld [vmem:[%s355_s7] sm:$0xff]  ;;  %vm416_vm1 = vcmask 130048  }
  0x76   : > { %1362 = vsyncadd (%p1772_p5), [#allocation9], 4294963200  ;;  %974 = vmatprep.subr.mxu0 %v1390_v0  ;;  %978 = vmatprep.mubr.msk.f32.mxu0 %vm1391_vm0, %v1390_v0  ;;  %v506_v4 = vld [vmem:[#allocation7 + $0x78] sm:$0xff]  ;;  %v505_v5 = vld [vmem:[#allocation7 + $0x70] sm:$0xff]  ;;  %s917_s18 = sshll.u32 %s1464_s15, 7  ;;  %s405_s19 = scalar_lea.vmem [#allocation11], %s905_s20 }
  0x77   : > { %981 = vmatprep.subr.mxu1 %v1390_v0  ;;  %1013 = vmatprep.mubr.msk.f32.mxu1 %vm1391_vm0, %v1390_v0  ;;  %v504_v6 = vld [vmem:[#allocation7 + $0x68] sm:$0xff]  ;;  %v503_v7 = vld [vmem:[#allocation7 + $0x60] sm:$0xff]  ;;  %v502_v8 = vld [vmem:[#allocation7 + $0x58] sm:$0xff]  ;;  %s787_s13 = sshll.u32 %s405_s19, 4  ;;  %s1701_s7 = scalar_lea.hbm %s1747_s9, %s917_s18  ;;  %s788_s13 = int_to_ptr.vmem [resolvable:$true] %s787_s13 }
  0x78   : > { %975 = vmatpush3.msra.mxu0 %v407_v1  ;;  %982 = vmatpush3.msra.mxu1 %v506_v4  ;;  %v501_v9 = vld [vmem:[#allocation7 + $0x50] sm:$0xff]  ;;  %v500_v10 = vld [vmem:[#allocation7 + $0x48] sm:$0xff]  ;;  %v499_v11 = vld [vmem:[#allocation7 + $0x40] sm:$0xff]  ;;  %s774_s1 = scalar_lea.sflag [#allocation4], %s1607_s3  ;;  %s1309_s16 = scalar_lea.vmem %s788_s13, 128 }
  0x79   : > { %976 = vmatprep.subr.mxu0 %v1390_v0  ;;  %983 = vmatprep.subr.mxu1 %v1390_v0  ;;  %v498_v12 = vld [vmem:[#allocation7 + $0x38] sm:$0xff]  ;;  %v497_v13 = vld [vmem:[#allocation7 + $0x30] sm:$0xff]  ;;  %v496_v14 = vld [vmem:[#allocation7 + $0x28] sm:$0xff]  ;;  %p1310_p8 = scmp.ne.s32.totalorder %s788_s13, %s1309_s16  ;;  %p1773_p7 = scmp.ne.s32.totalorder %s1764_s14, 0 }
  0x7a   : > { %977 = vmatpush3.msra.mxu0 %v406_v2  ;;  %984 = vmatpush3.msra.mxu1 %v505_v5  ;;  %v495_v15 = vld [vmem:[#allocation7 + $0x20] sm:$0xff]  ;;  %v494_v16 = vld [vmem:[#allocation7 + $0x18] sm:$0xff]  ;;  %v493_v17 = vld [vmem:[#allocation7 + $0x10] sm:$0xff]  ;;  %s1392_s15 = smov [#allocation11]  }
  0x7b   : > { %979 = vmatmul.mubr.msk.f32.vlgmr.msra.gmra.mxu0 %vm416_vm1, %v408_v3  ;;  %985 = vmatprep.subr.mxu1 %v1390_v0  ;;  %v492_v18 = vld [vmem:[#allocation7 + $0x8] sm:$0xff]  ;;  %v491_v19 = vld [vmem:[#allocation7] sm:$0xff]  ;;  %v600_v20 = vld [vmem:[#allocation8 + $0x78] sm:$0xff]  ;;  %p1311_p10 = pnand %p1310_p8, %p1773_p7  ;;  %s1313_s23 = sshll.u32 %s1392_s15, 4  ;;  %s1314_s23 = int_to_ptr.vmem [resolvable:$false] %s1313_s23 }
  0x7c   : > { %1016 = vmatprep.subr.mxu0 %v1390_v0  ;;  %986 = vmatpush3.msra.mxu1 %v504_v6  ;;  %v599_v21 = vld [vmem:[#allocation8 + $0x70] sm:$0xff]  ;;  %v598_v22 = vld [vmem:[#allocation8 + $0x68] sm:$0xff]  ;;  %v597_v23 = vld [vmem:[#allocation8 + $0x60] sm:$0xff]  ;;  %s1315_s20 = scalar_lea.vmem %s1314_s23, 256  ;;  %p1316_p12 = scmp.lt.s32.totalorder %s788_s13, %s1314_s23 }
  0x7d   : > { %1048 = vmatprep.mubr.msk.f32.mxu0 %vm1391_vm0, %v1390_v0  ;;  %987 = vmatprep.subr.mxu1 %v1390_v0  ;;  %v596_v24 = vld [vmem:[#allocation8 + $0x58] sm:$0xff]  ;;  %v595_v25 = vld [vmem:[#allocation8 + $0x50] sm:$0xff]  ;;  %v594_v26 = vld [vmem:[#allocation8 + $0x48] sm:$0xff]  ;;  %p1312_p0 = pneg %p1311_p10  ;;  %p1317_p2 = scmp.lt.s32.totalorder %s1315_s20, %s1309_s16 }
  0x7e   : > { %988 = vmatpush3.msra.mxu1 %v503_v7  ;;  %1017 = vmatpush3.msra.mxu0 %v600_v20  ;;  %v593_v27 = vld [vmem:[#allocation8 + $0x40] sm:$0xff]  ;;  %v592_v28 = vld [vmem:[#allocation8 + $0x38] sm:$0xff]  ;;  %v591_v29 = vld [vmem:[#allocation8 + $0x30] sm:$0xff] }
  0x7f   : > { %989 = vmatprep.subr.mxu1 %v1390_v0  ;;  %1018 = vmatprep.subr.mxu0 %v1390_v0  ;;  %v590_v30 = vld [vmem:[#allocation8 + $0x28] sm:$0xff]  ;;  %v589_v31 = vld [vmem:[#allocation8 + $0x20] sm:$0xff]  ;;  %v588_v32 = vld [vmem:[#allocation8 + $0x18] sm:$0xff]  ;;  %p1318_p9 = por %p1317_p2, %p1316_p12 }
  0x80   : > { %990 = vmatpush3.msra.mxu1 %v502_v8  ;;  %1019 = vmatpush3.msra.mxu0 %v599_v21  ;;  %v911_v33 = vld [vmem:[%s1740_s2] ss:$0 sm:$0xff]  ;;  %v587_v38 = vld [vmem:[#allocation8 + $0x10] sm:$0xff]  ;;  %v586_v39 = vld [vmem:[#allocation8 + $0x8] sm:$0xff] }
  0x81   : > { %991 = vmatprep.subr.mxu1 %v1390_v0  ;;  %1020 = vmatprep.subr.mxu0 %v1390_v0  ;;  %v585_v40 = vld [vmem:[#allocation8] sm:$0xff]  ;;  %v694_v41 = vld [vmem:[#allocation10 + $0x78] sm:$0xff]  ;;  %v693_v42 = vld [vmem:[#allocation10 + $0x70] sm:$0xff]  ;;  %p1319_p11 = pnand %p1318_p9, %p1312_p0 }
  0x82   : > { %992 = vmatpush3.msra.mxu1 %v501_v9  ;;  %1021 = vmatpush3.msra.mxu0 %v598_v22  ;;  %v692_v43 = vld [vmem:[#allocation10 + $0x68] sm:$0xff]  ;;  %v691_v44 = vld [vmem:[#allocation10 + $0x60] sm:$0xff]  ;;  %v690_v45 = vld [vmem:[#allocation10 + $0x58] sm:$0xff] }
  0x83   : > { %993 = vmatprep.subr.mxu1 %v1390_v0  ;;  %1022 = vmatprep.subr.mxu0 %v1390_v0  ;;  %v689_v46 = vld [vmem:[#allocation10 + $0x50] sm:$0xff]  ;;  %v688_v47 = vld [vmem:[#allocation10 + $0x48] sm:$0xff]  ;;  %v687_v48 = vld [vmem:[#allocation10 + $0x40] sm:$0xff] }
  0x84   : > { %994 = vmatpush3.msra.mxu1 %v500_v10  ;;  %1023 = vmatpush3.msra.mxu0 %v597_v23  ;;  %v686_v49 = vld [vmem:[#allocation10 + $0x38] sm:$0xff]  ;;  %v685_v50 = vld [vmem:[#allocation10 + $0x30] sm:$0xff]  ;;  %v684_v51 = vld [vmem:[#allocation10 + $0x28] sm:$0xff] }
  0x85   : > { %995 = vmatprep.subr.mxu1 %v1390_v0  ;;  %1024 = vmatprep.subr.mxu0 %v1390_v0  ;;  %v683_v52 = vld [vmem:[#allocation10 + $0x20] sm:$0xff]  ;;  %v682_v53 = vld [vmem:[#allocation10 + $0x18] sm:$0xff]  ;;  %v681_v59 = vld [vmem:[#allocation10 + $0x10] sm:$0xff] }
  0x86   : > { %996 = vmatpush3.msra.mxu1 %v499_v11  ;;  %1025 = vmatpush3.msra.mxu0 %v596_v24  ;;  %v913_v54 = vld [vmem:[%s1742_s4] ss:$0 sm:$0xff]  ;;  %v680_v60 = vld [vmem:[#allocation10 + $0x8] sm:$0xff] }
  0x87   : > { %997 = vmatprep.subr.mxu1 %v1390_v0  ;;  %1026 = vmatprep.subr.mxu0 %v1390_v0  ;;  %v679_v61 = vld [vmem:[#allocation10] sm:$0xff] }
  0x88   : > { %998 = vmatpush3.msra.mxu1 %v498_v12  ;;  %1027 = vmatpush3.msra.mxu0 %v595_v25  ;;  %v914_v62 = vld [vmem:[%s1744_s6] ss:$0 sm:$0xff] }
  0x89   : > { %999 = vmatprep.subr.mxu1 %v1390_v0  ;;  %1028 = vmatprep.subr.mxu0 %v1390_v0  ;;  %v915_v4 = vld [vmem:[%s1746_s8] ss:$0 sm:$0xff] }
  0x8a   : > { %1000 = vmatpush3.msra.mxu1 %v497_v13  ;;  %1029 = vmatpush3.msra.mxu0 %v594_v26 }
  0x8b   : > { %1001 = vmatprep.subr.mxu1 %v1390_v0  ;;  %1030 = vmatprep.subr.mxu0 %v1390_v0 }
  0x8c   : > { %1002 = vmatpush3.msra.mxu1 %v496_v14  ;;  %1031 = vmatpush3.msra.mxu0 %v593_v27 }
  0x8d   : > { %1003 = vmatprep.subr.mxu1 %v1390_v0  ;;  %1032 = vmatprep.subr.mxu0 %v1390_v0 }
  0x8e   : > { %1004 = vmatpush3.msra.mxu1 %v495_v15  ;;  %1033 = vmatpush3.msra.mxu0 %v592_v28 }
  0x8f   : > { %1005 = vmatprep.subr.mxu1 %v1390_v0  ;;  %1034 = vmatprep.subr.mxu0 %v1390_v0 }
  0x90   : > { %1006 = vmatpush3.msra.mxu1 %v494_v16  ;;  %1035 = vmatpush3.msra.mxu0 %v591_v29 }
  0x91   : > { %1007 = vmatprep.subr.mxu1 %v1390_v0  ;;  %1036 = vmatprep.subr.mxu0 %v1390_v0 }
  0x92   : > { %1008 = vmatpush3.msra.mxu1 %v493_v17  ;;  %1037 = vmatpush3.msra.mxu0 %v590_v30 }
  0x93   : > { %1009 = vmatprep.subr.mxu1 %v1390_v0  ;;  %1038 = vmatprep.subr.mxu0 %v1390_v0 }
  0x94   : > { %1010 = vmatpush3.msra.mxu1 %v492_v18  ;;  %1039 = vmatpush3.msra.mxu0 %v589_v31 }
  0x95   : > { %1011 = vmatprep.subr.mxu1 %v1390_v0  ;;  %1040 = vmatprep.subr.mxu0 %v1390_v0 }
  0x96   : > { %1012 = vmatpush3.msra.mxu1 %v491_v19  ;;  %1041 = vmatpush3.msra.mxu0 %v588_v32 }
  0x97   : > { %1051 = vmatprep.subr.mxu1 %v1390_v0  ;;  %1042 = vmatprep.subr.mxu0 %v1390_v0 }
  0x98   : > { %1043 = vmatpush3.msra.mxu0 %v587_v38 }
  0x99   : > { %1044 = vmatprep.subr.mxu0 %v1390_v0 }
  0x9a   : > { %1045 = vmatpush3.msra.mxu0 %v586_v39 }
  0x9b   : > { %1046 = vmatprep.subr.mxu0 %v1390_v0 }
  0x9c   : > { %1047 = vmatpush3.msra.mxu0 %v585_v40 }
 0x13b   : > { %v486_v34 = vpop.f32.mrf.mxu0 }
 0x13c   : > { %v487_v35 = vadd.f32 %v911_v33, %v486_v34 }
 0x13d   : > { %v980_v36 = vpop.f32.mrf.mxu0 }
 0x13e   : > { %v490_v37 = vmax.f32 %v487_v35, 0.0 }
 0x140   : > { %1014 = vmatmul.mubr.f32.vlgmr.msra.gmra.mxu1 %v490_v37 }
 0x141   : > { %1083 = vmatprep.mubr.msk.f32.mxu1 %vm1391_vm0, %v1390_v0  ;;  %1052 = vmatpush3.msra.mxu1 %v694_v41 }
 0x142   : > { %1053 = vmatprep.subr.mxu1 %v1390_v0 }
 0x143   : > { %1054 = vmatpush3.msra.mxu1 %v693_v42 }
 0x144   : > { %1055 = vmatprep.subr.mxu1 %v1390_v0 }
 0x145   : > { %1056 = vmatpush3.msra.mxu1 %v692_v43 }
 0x146   : > { %1057 = vmatprep.subr.mxu1 %v1390_v0 }
 0x147   : > { %1058 = vmatpush3.msra.mxu1 %v691_v44 }
 0x148   : > { %1059 = vmatprep.subr.mxu1 %v1390_v0 }
 0x149   : > { %1060 = vmatpush3.msra.mxu1 %v690_v45 }
 0x14a   : > { %1061 = vmatprep.subr.mxu1 %v1390_v0 }
 0x14b   : > { %1062 = vmatpush3.msra.mxu1 %v689_v46 }
 0x14c   : > { %1063 = vmatprep.subr.mxu1 %v1390_v0 }
 0x14d   : > { %1064 = vmatpush3.msra.mxu1 %v688_v47 }
 0x14e   : > { %1065 = vmatprep.subr.mxu1 %v1390_v0 }
 0x14f   : > { %1066 = vmatpush3.msra.mxu1 %v687_v48 }
 0x150   : > { %1067 = vmatprep.subr.mxu1 %v1390_v0 }
 0x151   : > { %1068 = vmatpush3.msra.mxu1 %v686_v49 }
 0x152   : > { %1069 = vmatprep.subr.mxu1 %v1390_v0 }
 0x153   : > { %1070 = vmatpush3.msra.mxu1 %v685_v50 }
 0x154   : > { %1071 = vmatprep.subr.mxu1 %v1390_v0 }
 0x155   : > { %1072 = vmatpush3.msra.mxu1 %v684_v51 }
 0x156   : > { %1073 = vmatprep.subr.mxu1 %v1390_v0 }
 0x157   : > { %1074 = vmatpush3.msra.mxu1 %v683_v52 }
 0x158   : > { %1075 = vmatprep.subr.mxu1 %v1390_v0 }
 0x159   : > { %1076 = vmatpush3.msra.mxu1 %v682_v53 }
 0x15a   : > { %1077 = vmatprep.subr.mxu1 %v1390_v0 }
 0x15b   : > { %1078 = vmatpush3.msra.mxu1 %v681_v59 }
 0x15c   : > { %1079 = vmatprep.subr.mxu1 %v1390_v0 }
 0x15d   : > { %1080 = vmatpush3.msra.mxu1 %v680_v60 }
 0x15e   : > { %1081 = vmatprep.subr.mxu1 %v1390_v0 }
 0x15f   : > { %1082 = vmatpush3.msra.mxu1 %v679_v61 }
 0x200   : > { %v580_v55 = vpop.f32.mrf.mxu1 }
 0x201   : > { %v581_v56 = vadd.f32 %v913_v54, %v580_v55 }
 0x202   : > { %v1015_v57 = vpop.f32.mrf.mxu1 }
 0x203   : > { %v584_v58 = vmax.f32 %v581_v56, 0.0 }
 0x205   : > { %1049 = vmatmul.mubr.f32.vlgmr.msra.gmra.mxu0 %v584_v58 }
 0x2c5   : > { %v674_v63 = vpop.f32.mrf.mxu0 }
 0x2c6   : > { %v675_v1 = vadd.f32 %v914_v62, %v674_v63 }
 0x2c7   : > { %v1050_v2 = vpop.f32.mrf.mxu0 }
 0x2c8   : > { %v678_v3 = vmax.f32 %v675_v1, 0.0 }
 0x2ca   : > { %1084 = vmatmul.mubr.f32.vlgmr.msra.gmra.mxu1 %v678_v3 }
 0x38a   : > { %v768_v0 = vpop.f32.mrf.mxu1 }
 0x38b   : > { %v769_v5 = vadd.f32 %v915_v4, %v768_v0 }
 0x38c   : > { %v1085_v6 = vpop.f32.mrf.mxu1 }
 0x38d   : > { %772 = vst [vmem:[%s405_s19] sm:$0xff] %v769_v5 }
 0x38e   : > { %1322 = shalt.err (!%p1319_p11)
}
 0x38f   : > { %s1323_s25 = scalar_lea.hbm %s1701_s7, 128  ;;  %s1327_s28 = scalar_lea.hbm %s1747_s9, 256 }
 0x390   : > { %p1324_p13 = scmp.ne.s32.totalorder %s1701_s7, %s1323_s25  ;;  %p1328_p4 = scmp.lt.s32.totalorder %s1701_s7, %s1747_s9 }
 0x391   : > { %p1329_p6 = scmp.lt.s32.totalorder %s1327_s28, %s1323_s25 }
 0x392   : > { %p1325_p1 = pnand %p1324_p13, %p1773_p7 }
 0x393   : > { %p1330_p5 = por %p1329_p6, %p1328_p4 }
 0x394   : > { %p1326_p3 = pneg %p1325_p1 }
 0x396   : > { %p1331_p8 = pnand %p1330_p5, %p1326_p3 }
 0x398   : > { %1334 = shalt.err (!%p1331_p8)
}
 0x399   : > { %1104 = dma.vmem_to_hbm [thread:$0]  (%p1773_p7), %s788_s13, 128, %s1701_s7, %s774_s1  }
 0x39a PF: > { %s799_s18 = sand.u32 1, %s1369_s30   ;;  %p1774_p10 = scmp.ne.s32.totalorder %s1765_s17, 0 }
 0x39b   : > { %p1775_p0 = scmp.ge.s32.totalorder %s1381_s12, 2  ;;  %s800_s19 = scalar_lea.sflag [#allocation4], %s799_s18 }
 0x39d   : > { %p1124_p12 = pnand %p1775_p0, %p1774_p10 }
 0x39f   : > { %p1125_p2 = pneg %p1124_p12 }
 0x3a1   : > { %1364 = dma.done.wait (%p1125_p2), %s800_s19, 128  }
 0x3a2   : > { %1366 = vsyncadd (%p1125_p2), %s800_s19, 4294967168  ;;  %p24_p9 = scmp.ge.s32.totalorder %s1544_s26, 4   ;;  %s1776_s30 = smov %s1373_s10 }
 0x3a3   : > { %s1777_s10 = smov %s1377_s11  ;;  %s1778_s11 = smov %s1555_s29 }
 0x3a4   : > { %s1779_s12 = smov %s1544_s26  ;;  %26 = sbr.rel (!%p24_p9) target bundleno = 12 (0xc), region = 117 }
 0x3a9   :  { %805 = vsyncpa [#allocation3], 1 }
 0x3aa   :  { %807 = vsyncpa [#allocation3 + $0x1], 1 }
 0x3ab   :  { %808 = vsyncpa [#allocation6], 1 }
 0x3ac   :  { %809 = vsyncpa [#allocation9], 1 }
 0x3ad   :  { %810 = vsyncpa [#allocation4], 1 }
 0x3ae   :  { %812 = vsyncpa [#allocation4 + $0x1], 1 }

</bundles_post_ra>
